<compile_context>
chip_gen: v7x
topology: tpu7x:2x2x1
jax: 0.10.0
libtpu: 0.0.40
codegen_flags: <defaults>
</compile_context>

<pallas_src>
import jax
import jax.numpy as jnp
from jax.experimental import pallas as pl
from jax.experimental.pallas import tpu as pltpu

HIDDEN_DIM = 64
DEFAULT_TILE_B = 1024


def _round_up(v, m):
    return ((v + m - 1) // m) * m


def _utility_kernel(x_ref, w1_ref, b1_ref, w2_ref, b2_ref, w3_ref, b3_ref, o_ref):
    # x tile: (TILE_B, latent). Cast to bf16 in-kernel (MXU-native input),
    # accumulate in f32 via preferred_element_type; elementwise math in f32.
    xb = x_ref[...].astype(jnp.bfloat16)
    h1 = jnp.dot(xb, w1_ref[...], preferred_element_type=jnp.float32) + b1_ref[...]
    h1 = jnp.maximum(h1, 0.0)
    h2 = jnp.dot(h1.astype(jnp.bfloat16), w2_ref[...],
                 preferred_element_type=jnp.float32) + b2_ref[...]
    h2 = jnp.maximum(h2, 0.0)
    # Final (hidden -> 1) layer: VPU multiply + XLU lane-reduce, not an N=1 MXU matmul.
    o_ref[...] = jnp.sum(h2 * w3_ref[...], axis=-1, keepdims=True) + b3_ref[0, 0]


def utility_forward(x, params, *, tile_b=DEFAULT_TILE_B):
    """x: any shape (B, ...); returns flattened (B,) utility values."""
    w1, b1, w2, b2, w3, b3 = params
    batch = x.shape[0]
    latent = w1.shape[0]
    x2d = x.reshape((batch, -1))
    assert x2d.shape[1] == latent, (x2d.shape, latent)

    # Pick a tile size: multiple of 8, no larger than needed for this batch.
    tile_b = max(8, min(tile_b, _round_up(batch, 8)))
    tile_b = _round_up(tile_b, 8)
    num_tiles = -(-batch // tile_b)
    b_pad = num_tiles * tile_b
    if b_pad != batch:
        x2d = jnp.pad(x2d, ((0, b_pad - batch), (0, 0)))

    # bf16 weights for the MXU; biases and the final (1, hidden) row stay f32.
    w1b = w1.astype(jnp.bfloat16)
    w2b = w2.astype(jnp.bfloat16)

    out = pl.pallas_call(
        _utility_kernel,
        out_shape=jax.ShapeDtypeStruct((b_pad, 1), jnp.float32),
        grid=(num_tiles,),
        in_specs=[
            pl.BlockSpec((tile_b, latent), lambda i: (i, 0)),           # x (streamed)
            pl.BlockSpec((latent, HIDDEN_DIM), lambda i: (0, 0)),       # w1 (resident)
            pl.BlockSpec((1, HIDDEN_DIM), lambda i: (0, 0)),            # b1
            pl.BlockSpec((HIDDEN_DIM, HIDDEN_DIM), lambda i: (0, 0)),   # w2 (resident)
            pl.BlockSpec((1, HIDDEN_DIM), lambda i: (0, 0)),            # b2
            pl.BlockSpec((1, HIDDEN_DIM), lambda i: (0, 0)),            # w3 row
            pl.BlockSpec(memory_space=pltpu.MemorySpace.SMEM),          # b3 scalar
        ],
        out_specs=pl.BlockSpec((tile_b, 1), lambda i: (i, 0)),
        compiler_params=pltpu.CompilerParams(
            dimension_semantics=("parallel",)),
    )(x2d, w1b, b1, w2b, b2, w3, b3)

    # th.flatten(...) on the (B, 1) result -> (B,); drop padded rows.
    return out[:batch].reshape(-1)


def init_params(key, latent_dim, hidden_dim=HIDDEN_DIM):
    """Deterministic init mimicking nn.Linear's U(-1/sqrt(fan_in), 1/sqrt(fan_in))."""
    def linear_init(k, fan_in, fan_out):
        kw, kb = jax.random.split(k)
        bound = 1.0 / jnp.sqrt(fan_in)
        w = jax.random.uniform(kw, (fan_in, fan_out), jnp.float32, -bound, bound)
        b = jax.random.uniform(kb, (1, fan_out), jnp.float32, -bound, bound)
        return w, b

    k1, k2, k3 = jax.random.split(key, 3)
    w1, b1 = linear_init(k1, latent_dim, hidden_dim)
    w2, b2 = linear_init(k2, hidden_dim, hidden_dim)
    w3t, b3 = linear_init(k3, hidden_dim, 1)   # (hidden, 1), (1, 1)
    w3 = w3t.T                                 # stored as a (1, hidden) row
    return (w1, b1, w2, b2, w3, b3)


def utility_ref(x, params):
    """Pure-JAX f32 reference for correctness checking."""
    w1, b1, w2, b2, w3, b3 = params
    h = x.reshape((x.shape[0], -1)).astype(jnp.float32)
    h = jnp.maximum(h @ w1 + b1, 0.0)
    h = jnp.maximum(h @ w2 + b2, 0.0)
    return (h @ w3.T + b3).reshape(-1)


if __name__ == "__main__":
    latent_dim = 32
    batch = 600      # not a multiple of tile_b -> exercises the padded tail tile
    tile_b = 256     # small tile so the demo runs a 3-step pipelined grid

    key = jax.random.PRNGKey(0)
    k_param, k_x = jax.random.split(key)
    params = init_params(k_param, latent_dim)

    # input already in flattened latent layout: (batch, latent_dim)
    x = jax.random.normal(k_x, (batch, latent_dim), jnp.float32)

    out = utility_forward(x, params, tile_b=tile_b)
    jax.block_until_ready(out)

    ref = utility_ref(x, params)
    assert out.shape == (batch,), out.shape
    # bf16 MXU inputs (f32 accumulation) vs the pure-f32 reference -> loosened tol.
    max_err = float(jnp.max(jnp.abs(out - ref)))
    assert jnp.allclose(out, ref, atol=7e-2, rtol=5e-2), f"mismatch, max_err={max_err}"

    print("KERNEL_OK")
</pallas_src>

<mosaic_0001>
module attributes {stable_mosaic.version = 11 : i64} {
  func.func @_utility_kernel(%arg0: i32, %arg1: memref<256x32xf32, #tpu.memory_space<vmem>>, %arg2: memref<32x64xbf16, #tpu.memory_space<vmem>>, %arg3: memref<1x64xf32, #tpu.memory_space<vmem>>, %arg4: memref<64x64xbf16, #tpu.memory_space<vmem>>, %arg5: memref<1x64xf32, #tpu.memory_space<vmem>>, %arg6: memref<1x64xf32, #tpu.memory_space<vmem>>, %arg7: memref<1x1xf32, #tpu.memory_space<smem>>, %arg8: memref<256x1xf32, #tpu.memory_space<vmem>>) attributes {dimension_semantics = [#tpu.dimension_semantics<parallel>], iteration_bounds = array<i64: 3>, scalar_prefetch = 0 : i64, scratch_operands = 0 : i64, tpu.core_type = #tpu.core_type<tc>, window_params = [{transform_indices = @transform_0, window_bounds = array<i64: 256, 32>}, {pipeline_mode = #tpu.pipeline_mode<synchronous>, transform_indices = @transform_1, window_bounds = array<i64: 32, 64>}, {pipeline_mode = #tpu.pipeline_mode<synchronous>, transform_indices = @transform_2, window_bounds = array<i64: 1, 64>}, {pipeline_mode = #tpu.pipeline_mode<synchronous>, transform_indices = @transform_3, window_bounds = array<i64: 64, 64>}, {pipeline_mode = #tpu.pipeline_mode<synchronous>, transform_indices = @transform_4, window_bounds = array<i64: 1, 64>}, {pipeline_mode = #tpu.pipeline_mode<synchronous>, transform_indices = @transform_5, window_bounds = array<i64: 1, 64>}, {transform_indices = @transform_6, window_bounds = array<i64: 1, 1>}, {transform_indices = @transform_7, window_bounds = array<i64: 256, 1>}]} {
    %c0 = arith.constant 0 : index
    %c0_0 = arith.constant 0 : index
    %0 = vector.load %arg1[%c0, %c0_0] : memref<256x32xf32, #tpu.memory_space<vmem>>, vector<256x32xf32>
    %1 = arith.truncf %0 : vector<256x32xf32> to vector<256x32xbf16>
    %c0_1 = arith.constant 0 : index
    %c0_2 = arith.constant 0 : index
    %2 = vector.load %arg2[%c0_1, %c0_2] : memref<32x64xbf16, #tpu.memory_space<vmem>>, vector<32x64xbf16>
    %cst = arith.constant dense<0.000000e+00> : vector<256x64xf32>
    %3 = tpu.matmul %1, %2, %cst {dimension_numbers = #tpu.dot_dimension_numbers<[1], [0], [0], [1], [0, 0, 1, 1], [], []>} : vector<256x32xbf16>, vector<32x64xbf16>, vector<256x64xf32> -> vector<256x64xf32>
    %c0_3 = arith.constant 0 : index
    %c0_4 = arith.constant 0 : index
    %4 = vector.load %arg3[%c0_3, %c0_4] : memref<1x64xf32, #tpu.memory_space<vmem>>, vector<1x64xf32>
    %5 = vector.broadcast %4 : vector<1x64xf32> to vector<256x64xf32>
    %6 = arith.addf %3, %5 : vector<256x64xf32>
    %cst_5 = arith.constant 0.000000e+00 : f32
    %7 = vector.broadcast %cst_5 : f32 to vector<256x64xf32>
    %8 = arith.maximumf %6, %7 : vector<256x64xf32>
    %9 = arith.truncf %8 : vector<256x64xf32> to vector<256x64xbf16>
    %c0_6 = arith.constant 0 : index
    %c0_7 = arith.constant 0 : index
    %10 = vector.load %arg4[%c0_6, %c0_7] : memref<64x64xbf16, #tpu.memory_space<vmem>>, vector<64x64xbf16>
    %cst_8 = arith.constant dense<0.000000e+00> : vector<256x64xf32>
    %11 = tpu.matmul %9, %10, %cst_8 {dimension_numbers = #tpu.dot_dimension_numbers<[1], [0], [0], [1], [0, 0, 1, 1], [], []>} : vector<256x64xbf16>, vector<64x64xbf16>, vector<256x64xf32> -> vector<256x64xf32>
    %c0_9 = arith.constant 0 : index
    %c0_10 = arith.constant 0 : index
    %12 = vector.load %arg5[%c0_9, %c0_10] : memref<1x64xf32, #tpu.memory_space<vmem>>, vector<1x64xf32>
    %13 = vector.broadcast %12 : vector<1x64xf32> to vector<256x64xf32>
    %14 = arith.addf %11, %13 : vector<256x64xf32>
    %cst_11 = arith.constant 0.000000e+00 : f32
    %15 = vector.broadcast %cst_11 : f32 to vector<256x64xf32>
    %16 = arith.maximumf %14, %15 : vector<256x64xf32>
    %c0_12 = arith.constant 0 : index
    %c0_13 = arith.constant 0 : index
    %17 = vector.load %arg6[%c0_12, %c0_13] : memref<1x64xf32, #tpu.memory_space<vmem>>, vector<1x64xf32>
    %18 = vector.broadcast %17 : vector<1x64xf32> to vector<256x64xf32>
    %19 = arith.mulf %16, %18 : vector<256x64xf32>
    %cst_14 = arith.constant dense<0.000000e+00> : vector<256xf32>
    %20 = vector.multi_reduction <add>, %19, %cst_14 [1] : vector<256x64xf32> to vector<256xf32>
    %21 = vector.shape_cast %20 : vector<256xf32> to vector<256x1xf32>
    %c0_15 = arith.constant 0 : index
    %c0_16 = arith.constant 0 : index
    %22 = memref.load %arg7[%c0_15, %c0_16] : memref<1x1xf32, #tpu.memory_space<smem>>
    %23 = vector.broadcast %22 : f32 to vector<256x1xf32>
    %24 = arith.addf %21, %23 : vector<256x1xf32>
    %c0_17 = arith.constant 0 : index
    %c0_18 = arith.constant 0 : index
    %25 = vector.load %arg8[%c0_17, %c0_18] : memref<256x1xf32, #tpu.memory_space<vmem>>, vector<256x1xf32>
    tpu.vector_store %arg8[%c0_17, %c0_18], %24 {strides = array<i32>} : memref<256x1xf32, #tpu.memory_space<vmem>>, vector<256x1xf32>,
    return
  }
  func.func @transform_0(%arg0: i32) -> (i32, i32) {
    %c0_i32 = arith.constant 0 : i32
    %c0_i32_0 = arith.constant 0 : i32
    return %arg0, %c0_i32 : i32, i32
  }
  func.func @transform_1(%arg0: i32) -> (i32, i32) {
    %c0_i32 = arith.constant 0 : i32
    %c0_i32_0 = arith.constant 0 : i32
    %c0_i32_1 = arith.constant 0 : i32
    return %c0_i32, %c0_i32_0 : i32, i32
  }
  func.func @transform_2(%arg0: i32) -> (i32, i32) {
    %c0_i32 = arith.constant 0 : i32
    %c0_i32_0 = arith.constant 0 : i32
    %c0_i32_1 = arith.constant 0 : i32
    return %c0_i32, %c0_i32_0 : i32, i32
  }
  func.func @transform_3(%arg0: i32) -> (i32, i32) {
    %c0_i32 = arith.constant 0 : i32
    %c0_i32_0 = arith.constant 0 : i32
    %c0_i32_1 = arith.constant 0 : i32
    return %c0_i32, %c0_i32_0 : i32, i32
  }
  func.func @transform_4(%arg0: i32) -> (i32, i32) {
    %c0_i32 = arith.constant 0 : i32
    %c0_i32_0 = arith.constant 0 : i32
    %c0_i32_1 = arith.constant 0 : i32
    return %c0_i32, %c0_i32_0 : i32, i32
  }
  func.func @transform_5(%arg0: i32) -> (i32, i32) {
    %c0_i32 = arith.constant 0 : i32
    %c0_i32_0 = arith.constant 0 : i32
    %c0_i32_1 = arith.constant 0 : i32
    return %c0_i32, %c0_i32_0 : i32, i32
  }
  func.func @transform_6(%arg0: i32) -> (i32, i32) {
    %c0_i32 = arith.constant 0 : i32
    %c0_i32_0 = arith.constant 0 : i32
    %c0_i32_1 = arith.constant 0 : i32
    return %c0_i32, %c0_i32_0 : i32, i32
  }
  func.func @transform_7(%arg0: i32) -> (i32, i32) {
    %c0_i32 = arith.constant 0 : i32
    %c0_i32_0 = arith.constant 0 : i32
    return %arg0, %c0_i32 : i32, i32
  }
}

</mosaic_0001>

<bundles_post_ra>
// kernel: tpu_custom_call.1
= control target key start
LH: loop header
LB: loop body
LE: loop exit
PB: predicated region body
PF: predicated region fallthrough
CT: control target
= control target key end

     0   :  { %s1383_s26 = smov 0   ;;  %s1734_s0 = inlined_call_operand.vmem [shape: f32[768,32], index: 0, kind: input, shape index: {}]   ;;  %s1735_s1 = inlined_call_operand.vmem [shape: bf16[32,64], index: 1, kind: input, shape index: {}]   ;;  %s1736_s2 = inlined_call_operand.vmem [shape: f32[1,64], index: 2, kind: input, shape index: {}]   ;;  %s1737_s3 = inlined_call_operand.vmem [shape: bf16[64,64], index: 3, kind: input, shape index: {}]   ;;  %s1738_s4 = inlined_call_operand.vmem [shape: f32[1,64], index: 4, kind: input, shape index: {}]   ;;  %s1739_s5 = inlined_call_operand.vmem [shape: f32[1,64], index: 5, kind: input, shape index: {}]   ;;  %s1740_s6 = inlined_call_operand.<no memory space> [shape: f32[1,1], index: 6, kind: input, shape index: {}]   ;;  %s1741_s7 = inlined_call_operand.vmem [shape: f32[768,1], index: 7, kind: output, shape index: {}]  }
   0x1   :  { %12 = sst [smem:[#allocation2]] %s1740_s6 }
   0x2 LB: > { %s1152_s27 = sadd.s32 4294967295, %s1338_s26   ;;  %p1156_p0 = scmp.ge.s32.totalorder %s1338_s26, 1  ;;  %s1338_s26 = sphi %s1383_s26, %s18_s26  }
   0x3   : > { %p239_p1 = scmp.lt.s32.totalorder %s1338_s26, 4 }
   0x5   : > { %p240_p2 = pnand %p1156_p0, %p239_p1 }
   0x6   : > { %v1326_v0 = vld [vmem:[%s1735_s1] sm:$0xff] (!%p240_p2)   ;;  %s1157_s6 = sshll.u32 (!%p240_p2), %s1152_s27, 5  ;;  %v1327_v1 = vld [vmem:[%s1735_s1 + $0x8] sm:$0xff] (!%p240_p2)   ;;  %vm355_vm0 = vcmask (!%p240_p2), 261120   ;;  %v1330_v52 = vld [vmem:[%s1737_s3 + $0x10] sm:$0xff] (!%p240_p2)   ;;  %vm652_vm1 = vcmask (!%p240_p2), 523264  }
   0x7   : > { %243 = sbr.rel (%p240_p2) target bundleno = 670 (0x29e), region = 48  ;;  %p272_p3 = scmp.lt.s32.totalorder (!%p240_p2), %s1157_s6, 95  ;;  %1242 = vmatprep.subr.bf16.mxu0 (!%p240_p2), %v1326_v0  ;;  %v1328_v2 = vld [vmem:[%s1737_s3] sm:$0xff] (!%p240_p2)   ;;  %v1329_v3 = vld [vmem:[%s1737_s3 + $0x8] sm:$0xff] (!%p240_p2)   ;;  %v1331_v53 = vld [vmem:[%s1737_s3 + $0x18] sm:$0xff] (!%p240_p2)   ;;  %vm1063_vm2 = vcmask (!%p240_p2), 7168  }
   0x8   : > { %1243 = vmatpush3.bf16.msra.mxu0 (!%p240_p2), %v1326_v0  ;;  %1278 = vmatprep.subr.bf16.mxu1 (!%p240_p2), %v1328_v2  ;;  %v1470_v54 = vld [vmem:[%s1736_s2] ss:$0 sm:$0xff] (!%p240_p2)  ;;  %s1029_s28 = sld [smem:[#allocation2]] (!%p240_p2) }
   0x9   : > { %1244 = vmatprep.subr.bf16.mxu0 (!%p240_p2), %v1327_v1  ;;  %1279 = vmatpush3.bf16.msra.mxu1 (!%p240_p2), %v1328_v2 }
   0xa   : > { %1280 = vmatprep.subr.bf16.mxu1 (!%p240_p2), %v1329_v3 }
   0xc   : > { %1245 = vmatpush3.bf16.msra.mxu0 (!%p240_p2), %v1327_v1 }
   0xd   : > { %1281 = vmatpush3.bf16.msra.mxu1 (!%p240_p2), %v1329_v3 }
   0xe   : > { %s1743_s6 = smov (!%p272_p3, %s1157_s6), 95  ;;  %1282 = vmatprep.subr.bf16.mxu1 %v1330_v52 }
   0xf   : > { %s1158_s13 = sshll.u32 %s1743_s6, 3 }
  0x10   : > { %s1411_s16 = scalar_lea.vmem %s1734_s0, %s1158_s13  ;;  %s1633_s8 = scalar_lea.vmem %s1741_s7, %s1158_s13 }
  0x11   : > { %v284_v4 = vld [vmem:[%s1411_s16] sm:$0xff]  ;;  %v285_v5 = vld [vmem:[%s1411_s16 + $0x8] sm:$0xff]  ;;  %v286_v6 = vld [vmem:[%s1411_s16 + $0x10] sm:$0xff]  ;;  %1283 = vmatpush3.bf16.msra.mxu1 %v1330_v52 }
  0x12   : > { %v316_v7 = vpack.c.bf16 %v285_v5, %v284_v4  ;;  %v287_v8 = vld [vmem:[%s1411_s16 + $0x18] sm:$0xff]  ;;  %v288_v9 = vld [vmem:[%s1411_s16 + $0x20] sm:$0xff]  ;;  %v289_v10 = vld [vmem:[%s1411_s16 + $0x28] sm:$0xff]  ;;  %1284 = vmatprep.subr.bf16.mxu1 %v1331_v53 }
  0x13   : > { %v317_v11 = vpack.c.bf16 %v287_v8, %v286_v6  ;;  %v318_v12 = vpack.c.bf16 %v289_v10, %v288_v9  ;;  %v290_v13 = vld [vmem:[%s1411_s16 + $0x30] sm:$0xff]  ;;  %v291_v14 = vld [vmem:[%s1411_s16 + $0x38] sm:$0xff]  ;;  %v292_v15 = vld [vmem:[%s1411_s16 + $0x40] sm:$0xff] }
  0x14   : > { %1246 = vmatprep.mubr.msk.bf16.mxu0 %vm355_vm0, %v316_v7  ;;  %v293_v16 = vld [vmem:[%s1411_s16 + $0x48] sm:$0xff]  ;;  %v319_v17 = vpack.c.bf16 %v291_v14, %v290_v13  ;;  %v294_v19 = vld [vmem:[%s1411_s16 + $0x50] sm:$0xff]  ;;  %v295_v20 = vld [vmem:[%s1411_s16 + $0x58] sm:$0xff] }
  0x15   : > { %1247 = vmatmul.mubr.msk.bf16.vlgmr.msra.gmra.mrb[0].mxu0 %vm355_vm0, %v317_v11  ;;  %v320_v18 = vpack.c.bf16 %v293_v16, %v292_v15  ;;  %v296_v21 = vld [vmem:[%s1411_s16 + $0x60] sm:$0xff]  ;;  %v297_v22 = vld [vmem:[%s1411_s16 + $0x68] sm:$0xff]  ;;  %v321_v23 = vpack.c.bf16 %v295_v20, %v294_v19  ;;  %v298_v25 = vld [vmem:[%s1411_s16 + $0x70] sm:$0xff]  ;;  %1285 = vmatpush3.bf16.msra.mxu1 %v1331_v53 }
  0x16   : > { %1250 = vmatprep.mubr.msk.bf16.mxu0 %vm355_vm0, %v318_v12  ;;  %v322_v24 = vpack.c.bf16 %v297_v22, %v296_v21  ;;  %v299_v26 = vld [vmem:[%s1411_s16 + $0x78] sm:$0xff]  ;;  %v300_v27 = vld [vmem:[%s1411_s16 + $0x80] sm:$0xff]  ;;  %v301_v28 = vld [vmem:[%s1411_s16 + $0x88] sm:$0xff] }
  0x17   : > { %v323_v29 = vpack.c.bf16 %v299_v26, %v298_v25  ;;  %v324_v30 = vpack.c.bf16 %v301_v28, %v300_v27  ;;  %v302_v31 = vld [vmem:[%s1411_s16 + $0x90] sm:$0xff]  ;;  %v303_v32 = vld [vmem:[%s1411_s16 + $0x98] sm:$0xff]  ;;  %v304_v33 = vld [vmem:[%s1411_s16 + $0xa0] sm:$0xff] }
  0x18   : > { %v305_v34 = vld [vmem:[%s1411_s16 + $0xa8] sm:$0xff]  ;;  %v325_v35 = vpack.c.bf16 %v303_v32, %v302_v31  ;;  %v306_v37 = vld [vmem:[%s1411_s16 + $0xb0] sm:$0xff]  ;;  %v307_v38 = vld [vmem:[%s1411_s16 + $0xb8] sm:$0xff] }
  0x19   : > { %v326_v36 = vpack.c.bf16 %v305_v34, %v304_v33  ;;  %v308_v39 = vld [vmem:[%s1411_s16 + $0xc0] sm:$0xff]  ;;  %v309_v40 = vld [vmem:[%s1411_s16 + $0xc8] sm:$0xff]  ;;  %v327_v41 = vpack.c.bf16 %v307_v38, %v306_v37  ;;  %v310_v43 = vld [vmem:[%s1411_s16 + $0xd0] sm:$0xff] }
  0x1a   : > { %v328_v42 = vpack.c.bf16 %v309_v40, %v308_v39  ;;  %v311_v44 = vld [vmem:[%s1411_s16 + $0xd8] sm:$0xff]  ;;  %v312_v45 = vld [vmem:[%s1411_s16 + $0xe0] sm:$0xff]  ;;  %v313_v46 = vld [vmem:[%s1411_s16 + $0xe8] sm:$0xff] }
  0x1b   : > { %v329_v47 = vpack.c.bf16 %v311_v44, %v310_v43  ;;  %v330_v48 = vpack.c.bf16 %v313_v46, %v312_v45  ;;  %v314_v49 = vld [vmem:[%s1411_s16 + $0xf0] sm:$0xff]  ;;  %v315_v50 = vld [vmem:[%s1411_s16 + $0xf8] sm:$0xff] }
  0x1c   : > { %v331_v51 = vpack.c.bf16 %v315_v50, %v314_v49 }
  0x1d   : > { %1251 = vmatmul.mubr.msk.bf16.gmra.mrb[4].mxu0 %vm355_vm0, %v319_v17 }
  0x1e   : > { %1254 = vmatprep.mubr.msk.bf16.mxu0 %vm355_vm0, %v320_v18 }
  0x25   : > { %1255 = vmatmul.mubr.msk.bf16.gmra.mrb[8].mxu0 %vm355_vm0, %v321_v23 }
  0x26   : > { %1258 = vmatprep.mubr.msk.bf16.mxu0 %vm355_vm0, %v322_v24 }
  0x2d   : > { %1259 = vmatmul.mubr.msk.bf16.gmra.mrb[12].mxu0 %vm355_vm0, %v323_v29 }
  0x2e   : > { %1262 = vmatprep.mubr.msk.bf16.mxu0 %vm355_vm0, %v324_v30 }
  0x35   : > { %1263 = vmatmul.mubr.msk.bf16.gmra.mrb[16].mxu0 %vm355_vm0, %v325_v35 }
  0x36   : > { %1266 = vmatprep.mubr.msk.bf16.mxu0 %vm355_vm0, %v326_v36 }
  0x3d   : > { %1267 = vmatmul.mubr.msk.bf16.gmra.mrb[20].mxu0 %vm355_vm0, %v327_v41 }
  0x3e   : > { %1270 = vmatprep.mubr.msk.bf16.mxu0 %vm355_vm0, %v328_v42 }
  0x45   : > { %1271 = vmatmul.mubr.msk.bf16.gmra.mrb[24].mxu0 %vm355_vm0, %v329_v47 }
  0x46   : > { %1274 = vmatprep.mubr.msk.bf16.mxu0 %vm355_vm0, %v330_v48 }
  0x4d   : > { %1275 = vmatmul.mubr.msk.bf16.gmra.mrb[28].mxu0 %vm355_vm0, %v331_v51 }
  0xe8   : > { %v1248_v55 = vpop.f32.mrb[0].mxu0 }
  0xe9   : > { %v447_v56 = vadd.f32 %v1248_v55, %v1470_v54  ;;  %v438_v57 = vpop.f32.mrb[1].mxu0 }
  0xea   : > { %v439_v58 = vadd.f32 %v1470_v54, %v438_v57  ;;  %v1249_v59 = vpop.f32.mrb[2].mxu0 }
  0xeb   : > { %v450_v60 = vadd.f32 %v1249_v59, %v1470_v54  ;;  %v441_v61 = vpop.f32.mrb[3].mxu0  ;;  %v567_v63 = vmax.f32 %v447_v56, 0.0 }
  0xec   : > { %v442_v62 = vadd.f32 %v1470_v54, %v441_v61  ;;  %v565_v1 = vmax.f32 %v439_v58, 0.0 }
  0xed   : > { %v568_v0 = vmax.f32 %v450_v60, 0.0 }
  0xee   : > { %v566_v2 = vmax.f32 %v442_v62, 0.0 }
  0xef   : > { %v598_v3 = vpack.c.bf16 %v568_v0, %v567_v63 }
  0xf0   : > { %v1252_v4 = vpop.f32.mrb[4].mxu0  ;;  %v597_v5 = vpack.c.bf16 %v566_v2, %v565_v1 }
  0xf1   : > { %v463_v6 = vadd.f32 %v1252_v4, %v1470_v54  ;;  %v454_v7 = vpop.f32.mrb[5].mxu0 }
  0xf2   : > { %v455_v8 = vadd.f32 %v1470_v54, %v454_v7  ;;  %v1253_v9 = vpop.f32.mrb[6].mxu0  ;;  %1286 = vmatprep.mubr.msk.bf16.mxu1 %vm652_vm1, %v597_v5 }
  0xf3   : > { %v466_v10 = vadd.f32 %v1253_v9, %v1470_v54  ;;  %v457_v11 = vpop.f32.mrb[7].mxu0  ;;  %1287 = vmatmul.mubr.msk.bf16.vlgmr.msra.gmra.mrb[0].mxu1 %vm652_vm1, %v598_v3  ;;  %v571_v13 = vmax.f32 %v463_v6, 0.0 }
  0xf4   : > { %v458_v12 = vadd.f32 %v1470_v54, %v457_v11  ;;  %v569_v15 = vmax.f32 %v455_v8, 0.0 }
  0xf5   : > { %v572_v14 = vmax.f32 %v466_v10, 0.0 }
  0xf6   : > { %v570_v16 = vmax.f32 %v458_v12, 0.0 }
  0xf7   : > { %v600_v17 = vpack.c.bf16 %v572_v14, %v571_v13 }
  0xf8   : > { %v599_v18 = vpack.c.bf16 %v570_v16, %v569_v15  ;;  %v1256_v19 = vpop.f32.mrb[8].mxu0 }
  0xf9   : > { %v479_v20 = vadd.f32 %v1256_v19, %v1470_v54  ;;  %v470_v21 = vpop.f32.mrb[9].mxu0 }
  0xfa   : > { %v471_v22 = vadd.f32 %v1470_v54, %v470_v21  ;;  %v1257_v23 = vpop.f32.mrb[10].mxu0  ;;  %1290 = vmatprep.mubr.msk.bf16.mxu1 %vm652_vm1, %v599_v18 }
  0xfb   : > { %v482_v24 = vadd.f32 %v1257_v23, %v1470_v54  ;;  %v473_v25 = vpop.f32.mrb[11].mxu0  ;;  %1291 = vmatmul.mubr.msk.bf16.gmra.mrb[4].mxu1 %vm652_vm1, %v600_v17  ;;  %v575_v27 = vmax.f32 %v479_v20, 0.0 }
  0xfc   : > { %v474_v26 = vadd.f32 %v1470_v54, %v473_v25  ;;  %v573_v29 = vmax.f32 %v471_v22, 0.0 }
  0xfd   : > { %v576_v28 = vmax.f32 %v482_v24, 0.0 }
  0xfe   : > { %v574_v30 = vmax.f32 %v474_v26, 0.0 }
  0xff   : > { %v602_v31 = vpack.c.bf16 %v576_v28, %v575_v27 }
 0x100   : > { %v601_v32 = vpack.c.bf16 %v574_v30, %v573_v29  ;;  %v1260_v33 = vpop.f32.mrb[12].mxu0 }
 0x101   : > { %v495_v34 = vadd.f32 %v1260_v33, %v1470_v54  ;;  %v486_v35 = vpop.f32.mrb[13].mxu0 }
 0x102   : > { %v487_v36 = vadd.f32 %v1470_v54, %v486_v35  ;;  %v1261_v37 = vpop.f32.mrb[14].mxu0  ;;  %1294 = vmatprep.mubr.msk.bf16.mxu1 %vm652_vm1, %v601_v32 }
 0x103   : > { %v498_v38 = vadd.f32 %v1261_v37, %v1470_v54  ;;  %v489_v39 = vpop.f32.mrb[15].mxu0  ;;  %1295 = vmatmul.mubr.msk.bf16.gmra.mrb[8].mxu1 %vm652_vm1, %v602_v31  ;;  %v579_v41 = vmax.f32 %v495_v34, 0.0 }
 0x104   : > { %v490_v40 = vadd.f32 %v1470_v54, %v489_v39  ;;  %v577_v43 = vmax.f32 %v487_v36, 0.0 }
 0x105   : > { %v580_v42 = vmax.f32 %v498_v38, 0.0 }
 0x106   : > { %v578_v44 = vmax.f32 %v490_v40, 0.0  ;;  %v1523_v40 = vld [vmem:[%s1738_s4] ss:$0 sm:$0xff] }
 0x107   : > { %v604_v45 = vpack.c.bf16 %v580_v42, %v579_v41 }
 0x108   : > { %v603_v46 = vpack.c.bf16 %v578_v44, %v577_v43  ;;  %v1264_v47 = vpop.f32.mrb[16].mxu0 }
 0x109   : > { %v511_v48 = vadd.f32 %v1264_v47, %v1470_v54  ;;  %v502_v49 = vpop.f32.mrb[17].mxu0 }
 0x10a   : > { %v503_v50 = vadd.f32 %v1470_v54, %v502_v49  ;;  %v1265_v51 = vpop.f32.mrb[18].mxu0  ;;  %1298 = vmatprep.mubr.msk.bf16.mxu1 %vm652_vm1, %v603_v46 }
 0x10b   : > { %v514_v52 = vadd.f32 %v1265_v51, %v1470_v54  ;;  %v505_v53 = vpop.f32.mrb[19].mxu0  ;;  %1299 = vmatmul.mubr.msk.bf16.gmra.mrb[12].mxu1 %vm652_vm1, %v604_v45  ;;  %v583_v56 = vmax.f32 %v511_v48, 0.0  ;;  %v1530_v45 = vld [vmem:[%s1739_s5] ss:$0 sm:$0xff] }
 0x10c   : > { %v506_v55 = vadd.f32 %v1470_v54, %v505_v53  ;;  %v581_v58 = vmax.f32 %v503_v50, 0.0 }
 0x10d   : > { %v584_v57 = vmax.f32 %v514_v52, 0.0 }
 0x10e   : > { %v582_v59 = vmax.f32 %v506_v55, 0.0 }
 0x10f   : > { %v606_v60 = vpack.c.bf16 %v584_v57, %v583_v56 }
 0x110   : > { %v605_v61 = vpack.c.bf16 %v582_v59, %v581_v58  ;;  %v1268_v62 = vpop.f32.mrb[20].mxu0 }
 0x111   : > { %v527_v63 = vadd.f32 %v1268_v62, %v1470_v54  ;;  %v518_v0 = vpop.f32.mrb[21].mxu0 }
 0x112   : > { %v519_v1 = vadd.f32 %v1470_v54, %v518_v0  ;;  %v1269_v2 = vpop.f32.mrb[22].mxu0  ;;  %1302 = vmatprep.mubr.msk.bf16.mxu1 %vm652_vm1, %v605_v61 }
 0x113   : > { %v530_v3 = vadd.f32 %v1269_v2, %v1470_v54  ;;  %v521_v4 = vpop.f32.mrb[23].mxu0  ;;  %1303 = vmatmul.mubr.msk.bf16.gmra.mrb[16].mxu1 %vm652_vm1, %v606_v60  ;;  %v587_v6 = vmax.f32 %v527_v63, 0.0 }
 0x114   : > { %v522_v5 = vadd.f32 %v1470_v54, %v521_v4  ;;  %v585_v8 = vmax.f32 %v519_v1, 0.0 }
 0x115   : > { %v588_v7 = vmax.f32 %v530_v3, 0.0 }
 0x116   : > { %v586_v9 = vmax.f32 %v522_v5, 0.0 }
 0x117   : > { %v608_v10 = vpack.c.bf16 %v588_v7, %v587_v6 }
 0x118   : > { %v607_v11 = vpack.c.bf16 %v586_v9, %v585_v8  ;;  %v1272_v12 = vpop.f32.mrb[24].mxu0 }
 0x119   : > { %v543_v13 = vadd.f32 %v1272_v12, %v1470_v54  ;;  %v534_v14 = vpop.f32.mrb[25].mxu0 }
 0x11a   : > { %v535_v15 = vadd.f32 %v1470_v54, %v534_v14  ;;  %v1273_v16 = vpop.f32.mrb[26].mxu0  ;;  %1306 = vmatprep.mubr.msk.bf16.mxu1 %vm652_vm1, %v607_v11 }
 0x11b   : > { %v546_v17 = vadd.f32 %v1273_v16, %v1470_v54  ;;  %v537_v18 = vpop.f32.mrb[27].mxu0  ;;  %1307 = vmatmul.mubr.msk.bf16.gmra.mrb[20].mxu1 %vm652_vm1, %v608_v10  ;;  %v591_v20 = vmax.f32 %v543_v13, 0.0 }
 0x11c   : > { %v538_v19 = vadd.f32 %v1470_v54, %v537_v18  ;;  %v589_v22 = vmax.f32 %v535_v15, 0.0 }
 0x11d   : > { %v592_v21 = vmax.f32 %v546_v17, 0.0 }
 0x11e   : > { %v590_v23 = vmax.f32 %v538_v19, 0.0 }
 0x11f   : > { %v610_v24 = vpack.c.bf16 %v592_v21, %v591_v20 }
 0x120   : > { %v609_v25 = vpack.c.bf16 %v590_v23, %v589_v22  ;;  %v1276_v26 = vpop.f32.mrb[28].mxu0 }
 0x121   : > { %v559_v27 = vadd.f32 %v1276_v26, %v1470_v54  ;;  %v550_v28 = vpop.f32.mrb[29].mxu0 }
 0x122   : > { %v551_v29 = vadd.f32 %v1470_v54, %v550_v28  ;;  %v1277_v30 = vpop.f32.mrb[30].mxu0  ;;  %1310 = vmatprep.mubr.msk.bf16.mxu1 %vm652_vm1, %v609_v25 }
 0x123   : > { %v562_v31 = vadd.f32 %v1277_v30, %v1470_v54  ;;  %v553_v32 = vpop.f32.mrb[31].mxu0  ;;  %1311 = vmatmul.mubr.msk.bf16.gmra.mrb[24].mxu1 %vm652_vm1, %v610_v24  ;;  %v595_v34 = vmax.f32 %v559_v27, 0.0 }
 0x124   : > { %v554_v33 = vadd.f32 %v1470_v54, %v553_v32  ;;  %v593_v36 = vmax.f32 %v551_v29, 0.0 }
 0x125   : > { %v596_v35 = vmax.f32 %v562_v31, 0.0 }
 0x126   : > { %v594_v37 = vmax.f32 %v554_v33, 0.0 }
 0x127   : > { %v612_v38 = vpack.c.bf16 %v596_v35, %v595_v34 }
 0x128   : > { %v611_v39 = vpack.c.bf16 %v594_v37, %v593_v36 }
 0x12a   : > { %1314 = vmatprep.mubr.msk.bf16.mxu1 %vm652_vm1, %v611_v39 }
 0x12b   : > { %1315 = vmatmul.mubr.msk.bf16.gmra.mrb[28].mxu1 %vm652_vm1, %v612_v38 }
 0x1c6   : > { %v1288_v41 = vpop.f32.mrb[0].mxu1 }
 0x1c7   : > { %v744_v42 = vadd.f32 %v1288_v41, %v1523_v40  ;;  %v735_v43 = vpop.f32.mrb[1].mxu1 }
 0x1c8   : > { %v736_v54 = vadd.f32 %v1523_v40, %v735_v43  ;;  %v1289_v44 = vpop.f32.mrb[2].mxu1 }
 0x1c9   : > { %v864_v46 = vmax.f32 %v744_v42, 0.0  ;;  %v747_v47 = vadd.f32 %v1289_v44, %v1523_v40  ;;  %v738_v48 = vpop.f32.mrb[3].mxu1 }
 0x1ca   : > { %v862_v49 = vmax.f32 %v736_v54, 0.0  ;;  %v739_v50 = vadd.f32 %v1523_v40, %v738_v48 }
 0x1cb   : > { %v865_v51 = vmax.f32 %v747_v47, 0.0  ;;  %v903_v52 = vmul.f32 %v1530_v45, %v864_v46 }
 0x1cc   : > { %v863_v53 = vmax.f32 %v739_v50, 0.0  ;;  %v901_v55 = vmul.f32 %v1530_v45, %v862_v49 }
 0x1cd   : > { %v939_v56 = vsel %vm652_vm1, %v903_v52, 0.0  ;;  %v904_v57 = vmul.f32 %v1530_v45, %v865_v51 }
 0x1ce   : > { %940 = vadd.xlane.f32.xlu1 %v939_v56  ;;  %v1292_v58 = vpop.f32.mrb[4].mxu1  ;;  %v933_v59 = vsel %vm652_vm1, %v901_v55, 0.0  ;;  %v902_v60 = vmul.f32 %v1530_v45, %v863_v53 }
 0x1cf   : > { %v760_v61 = vadd.f32 %v1292_v58, %v1523_v40  ;;  %v751_v62 = vpop.f32.mrb[5].mxu1  ;;  %934 = vadd.xlane.f32.xlu0 %v933_v59  ;;  %v942_v4 = vsel %vm652_vm1, %v904_v57, 0.0 }
 0x1d0   : > { %v752_v63 = vadd.f32 %v1523_v40, %v751_v62  ;;  %v1293_v0 = vpop.f32.mrb[6].mxu1  ;;  %v936_v7 = vsel %vm652_vm1, %v902_v60, 0.0 }
 0x1d1   : > { %v868_v1 = vmax.f32 %v760_v61, 0.0  ;;  %v763_v2 = vadd.f32 %v1293_v0, %v1523_v40  ;;  %v754_v3 = vpop.f32.mrb[7].mxu1 }
 0x1d2   : > { %v866_v5 = vmax.f32 %v752_v63, 0.0  ;;  %v755_v6 = vadd.f32 %v1523_v40, %v754_v3  ;;  %943 = vadd.xlane.f32.xlu1 %v942_v4 }
 0x1d3   : > { %v869_v8 = vmax.f32 %v763_v2, 0.0  ;;  %937 = vadd.xlane.f32.xlu0 %v936_v7  ;;  %v907_v9 = vmul.f32 %v1530_v45, %v868_v1 }
 0x1d4   : > { %v867_v10 = vmax.f32 %v755_v6, 0.0  ;;  %v905_v14 = vmul.f32 %v1530_v45, %v866_v5 }
 0x1d5   : > { %v951_v11 = vsel %vm652_vm1, %v907_v9, 0.0  ;;  %v908_v12 = vmul.f32 %v1530_v45, %v869_v8 }
 0x1d6   : > { %v1296_v13 = vpop.f32.mrb[8].mxu1  ;;  %v906_v18 = vmul.f32 %v1530_v45, %v867_v10  ;;  %v945_v26 = vsel %vm652_vm1, %v905_v14, 0.0 }
 0x1d7   : > { %v776_v15 = vadd.f32 %v1296_v13, %v1523_v40  ;;  %v767_v16 = vpop.f32.mrb[9].mxu1  ;;  %952 = vadd.xlane.f32.xlu0 %v951_v11  ;;  %v954_v17 = vsel %vm652_vm1, %v908_v12, 0.0 }
 0x1d8   : > { %v768_v19 = vadd.f32 %v1523_v40, %v767_v16  ;;  %955 = vadd.xlane.f32.xlu1 %v954_v17  ;;  %v1297_v20 = vpop.f32.mrb[10].mxu1  ;;  %v948_v28 = vsel %vm652_vm1, %v906_v18, 0.0 }
 0x1d9   : > { %v872_v21 = vmax.f32 %v776_v15, 0.0  ;;  %v779_v22 = vadd.f32 %v1297_v20, %v1523_v40  ;;  %v770_v23 = vpop.f32.mrb[11].mxu1 }
 0x1da   : > { %v870_v24 = vmax.f32 %v768_v19, 0.0  ;;  %v771_v25 = vadd.f32 %v1523_v40, %v770_v23 }
 0x1db   : > { %v873_v27 = vmax.f32 %v779_v22, 0.0  ;;  %946 = vadd.xlane.f32.xlu0 %v945_v26  ;;  %v911_v29 = vmul.f32 %v1530_v45, %v872_v21 }
 0x1dc   : > { %v871_v30 = vmax.f32 %v771_v25, 0.0  ;;  %949 = vadd.xlane.f32.xlu1 %v948_v28  ;;  %v909_v34 = vmul.f32 %v1530_v45, %v870_v24 }
 0x1dd   : > { %v963_v31 = vsel %vm652_vm1, %v911_v29, 0.0  ;;  %v912_v32 = vmul.f32 %v1530_v45, %v873_v27 }
 0x1de   : > { %v1300_v33 = vpop.f32.mrb[12].mxu1  ;;  %v910_v38 = vmul.f32 %v1530_v45, %v871_v30  ;;  %v957_v47 = vsel %vm652_vm1, %v909_v34, 0.0 }
 0x1df   : > { %v792_v35 = vadd.f32 %v1300_v33, %v1523_v40  ;;  %v783_v36 = vpop.f32.mrb[13].mxu1  ;;  %964 = vadd.xlane.f32.xlu0 %v963_v31  ;;  %v966_v37 = vsel %vm652_vm1, %v912_v32, 0.0 }
 0x1e0   : > { %v784_v39 = vadd.f32 %v1523_v40, %v783_v36  ;;  %v1301_v41 = vpop.f32.mrb[14].mxu1  ;;  %967 = vadd.xlane.f32.xlu1 %v966_v37  ;;  %v960_v49 = vsel %vm652_vm1, %v910_v38, 0.0 }
 0x1e1   : > { %v876_v42 = vmax.f32 %v792_v35, 0.0  ;;  %v795_v43 = vadd.f32 %v1301_v41, %v1523_v40  ;;  %v786_v54 = vpop.f32.mrb[15].mxu1 }
 0x1e2   : > { %v874_v44 = vmax.f32 %v784_v39, 0.0  ;;  %v787_v46 = vadd.f32 %v1523_v40, %v786_v54 }
 0x1e3   : > { %v877_v48 = vmax.f32 %v795_v43, 0.0  ;;  %958 = vadd.xlane.f32.xlu0 %v957_v47  ;;  %v915_v50 = vmul.f32 %v1530_v45, %v876_v42 }
 0x1e4   : > { %v875_v51 = vmax.f32 %v787_v46, 0.0  ;;  %961 = vadd.xlane.f32.xlu1 %v960_v49  ;;  %v913_v56 = vmul.f32 %v1530_v45, %v874_v44 }
 0x1e5   : > { %v975_v52 = vsel %vm652_vm1, %v915_v50, 0.0  ;;  %v916_v53 = vmul.f32 %v1530_v45, %v877_v48 }
 0x1e6   : > { %v1304_v55 = vpop.f32.mrb[16].mxu1  ;;  %v914_v60 = vmul.f32 %v1530_v45, %v875_v51  ;;  %v969_v4 = vsel %vm652_vm1, %v913_v56, 0.0 }
 0x1e7   : > { %v808_v57 = vadd.f32 %v1304_v55, %v1523_v40  ;;  %v799_v58 = vpop.f32.mrb[17].mxu1  ;;  %976 = vadd.xlane.f32.xlu0 %v975_v52  ;;  %v978_v59 = vsel %vm652_vm1, %v916_v53, 0.0 }
 0x1e8   : > { %v800_v61 = vadd.f32 %v1523_v40, %v799_v58  ;;  %v1305_v62 = vpop.f32.mrb[18].mxu1  ;;  %979 = vadd.xlane.f32.xlu1 %v978_v59  ;;  %v972_v6 = vsel %vm652_vm1, %v914_v60, 0.0 }
 0x1e9   : > { %v880_v63 = vmax.f32 %v808_v57, 0.0  ;;  %v811_v0 = vadd.f32 %v1305_v62, %v1523_v40  ;;  %v802_v1 = vpop.f32.mrb[19].mxu1 }
 0x1ea   : > { %v878_v2 = vmax.f32 %v800_v61, 0.0  ;;  %v803_v3 = vadd.f32 %v1523_v40, %v802_v1 }
 0x1eb   : > { %v881_v5 = vmax.f32 %v811_v0, 0.0  ;;  %970 = vadd.xlane.f32.xlu0 %v969_v4  ;;  %v919_v7 = vmul.f32 %v1530_v45, %v880_v63 }
 0x1ec   : > { %v879_v8 = vmax.f32 %v803_v3, 0.0  ;;  %973 = vadd.xlane.f32.xlu1 %v972_v6  ;;  %v917_v12 = vmul.f32 %v1530_v45, %v878_v2 }
 0x1ed   : > { %v987_v9 = vsel %vm652_vm1, %v919_v7, 0.0  ;;  %v920_v10 = vmul.f32 %v1530_v45, %v881_v5 }
 0x1ee   : > { %v1308_v11 = vpop.f32.mrb[20].mxu1  ;;  %v918_v16 = vmul.f32 %v1530_v45, %v879_v8  ;;  %v981_v24 = vsel %vm652_vm1, %v917_v12, 0.0 }
 0x1ef   : > { %v824_v13 = vadd.f32 %v1308_v11, %v1523_v40  ;;  %v815_v14 = vpop.f32.mrb[21].mxu1  ;;  %988 = vadd.xlane.f32.xlu0 %v987_v9  ;;  %v990_v15 = vsel %vm652_vm1, %v920_v10, 0.0 }
 0x1f0   : > { %v816_v17 = vadd.f32 %v1523_v40, %v815_v14  ;;  %v1309_v18 = vpop.f32.mrb[22].mxu1  ;;  %991 = vadd.xlane.f32.xlu1 %v990_v15  ;;  %v984_v26 = vsel %vm652_vm1, %v918_v16, 0.0 }
 0x1f1   : > { %v884_v19 = vmax.f32 %v824_v13, 0.0  ;;  %v827_v20 = vadd.f32 %v1309_v18, %v1523_v40  ;;  %v818_v21 = vpop.f32.mrb[23].mxu1  ;;  %v1626_v13 = vstv %s1029_s28 }
 0x1f2   : > { %v882_v22 = vmax.f32 %v816_v17, 0.0  ;;  %v819_v23 = vadd.f32 %v1523_v40, %v818_v21 }
 0x1f3   : > { %v885_v25 = vmax.f32 %v827_v20, 0.0  ;;  %982 = vadd.xlane.f32.xlu0 %v981_v24  ;;  %v923_v27 = vmul.f32 %v1530_v45, %v884_v19 }
 0x1f4   : > { %v883_v28 = vmax.f32 %v819_v23, 0.0  ;;  %985 = vadd.xlane.f32.xlu1 %v984_v26  ;;  %v921_v32 = vmul.f32 %v1530_v45, %v882_v22 }
 0x1f5   : > { %v999_v29 = vsel %vm652_vm1, %v923_v27, 0.0  ;;  %v924_v30 = vmul.f32 %v1530_v45, %v885_v25 }
 0x1f6   : > { %v1312_v31 = vpop.f32.mrb[24].mxu1  ;;  %v922_v36 = vmul.f32 %v1530_v45, %v883_v28  ;;  %v993_v44 = vsel %vm652_vm1, %v921_v32, 0.0 }
 0x1f7   : > { %v840_v33 = vadd.f32 %v1312_v31, %v1523_v40  ;;  %v831_v34 = vpop.f32.mrb[25].mxu1  ;;  %1000 = vadd.xlane.f32.xlu0 %v999_v29  ;;  %v1002_v35 = vsel %vm652_vm1, %v924_v30, 0.0 }
 0x1f8   : > { %v832_v37 = vadd.f32 %v1523_v40, %v831_v34  ;;  %v1313_v38 = vpop.f32.mrb[26].mxu1  ;;  %1003 = vadd.xlane.f32.xlu1 %v1002_v35  ;;  %v996_v47 = vsel %vm652_vm1, %v922_v36, 0.0 }
 0x1f9   : > { %v888_v39 = vmax.f32 %v840_v33, 0.0  ;;  %v843_v41 = vadd.f32 %v1313_v38, %v1523_v40  ;;  %v834_v42 = vpop.f32.mrb[27].mxu1 }
 0x1fa   : > { %v886_v43 = vmax.f32 %v832_v37, 0.0  ;;  %v835_v54 = vadd.f32 %v1523_v40, %v834_v42 }
 0x1fb   : > { %v889_v46 = vmax.f32 %v843_v41, 0.0  ;;  %994 = vadd.xlane.f32.xlu0 %v993_v44  ;;  %v927_v48 = vmul.f32 %v1530_v45, %v888_v39 }
 0x1fc   : > { %v887_v49 = vmax.f32 %v835_v54, 0.0  ;;  %997 = vadd.xlane.f32.xlu1 %v996_v47  ;;  %v925_v53 = vmul.f32 %v1530_v45, %v886_v43 }
 0x1fd   : > { %v1011_v50 = vsel %vm652_vm1, %v927_v48, 0.0  ;;  %v928_v51 = vmul.f32 %v1530_v45, %v889_v46 }
 0x1fe   : > { %v1316_v52 = vpop.f32.mrb[28].mxu1  ;;  %v926_v58 = vmul.f32 %v1530_v45, %v887_v49  ;;  %v1005_v2 = vsel %vm652_vm1, %v925_v53, 0.0 }
 0x1ff   : > { %v856_v55 = vadd.f32 %v1316_v52, %v1523_v40  ;;  %v847_v56 = vpop.f32.mrb[29].mxu1  ;;  %1012 = vadd.xlane.f32.xlu0 %v1011_v50  ;;  %v1014_v57 = vsel %vm652_vm1, %v928_v51, 0.0 }
 0x200   : > { %v848_v59 = vadd.f32 %v1523_v40, %v847_v56  ;;  %v1317_v60 = vpop.f32.mrb[30].mxu1  ;;  %1015 = vadd.xlane.f32.xlu1 %v1014_v57  ;;  %v1008_v3 = vsel %vm652_vm1, %v926_v58, 0.0 }
 0x201   : > { %v859_v61 = vadd.f32 %v1317_v60, %v1523_v40  ;;  %v850_v62 = vpop.f32.mrb[31].mxu1  ;;  %v892_v63 = vmax.f32 %v856_v55, 0.0 }
 0x202   : > { %v890_v0 = vmax.f32 %v848_v59, 0.0  ;;  %v851_v1 = vadd.f32 %v1523_v40, %v850_v62 }
 0x203   : > { %1006 = vadd.xlane.f32.xlu0 %v1005_v2  ;;  %v893_v4 = vmax.f32 %v859_v61, 0.0  ;;  %v931_v9 = vmul.f32 %v1530_v45, %v892_v63 }
 0x204   : > { %v891_v5 = vmax.f32 %v851_v1, 0.0  ;;  %1009 = vadd.xlane.f32.xlu1 %v1008_v3  ;;  %v929_v6 = vmul.f32 %v1530_v45, %v890_v0 }
 0x205   : > { %v932_v10 = vmul.f32 %v1530_v45, %v893_v4  ;;  %v1023_v11 = vsel %vm652_vm1, %v931_v9, 0.0 }
 0x206   : > { %v1017_v7 = vsel %vm652_vm1, %v929_v6, 0.0  ;;  %v930_v8 = vmul.f32 %v1530_v45, %v891_v5 }
 0x207   : > { %1018 = vadd.xlane.f32.xlu0 %v1017_v7  ;;  %v1026_v12 = vsel %vm652_vm1, %v932_v10, 0.0 }
 0x208   : > { %v1020_v40 = vsel %vm652_vm1, %v930_v8, 0.0 }
 0x209   : > { %1021 = vadd.xlane.f32.xlu1 %v1020_v40 }
 0x20b   : > { %1024 = vadd.xlane.f32.xlu0 %v1023_v11 }
 0x20d   : > { %1027 = vadd.xlane.f32.xlu1 %v1026_v12 }
 0x25b   : > { %v941_v45 = vpop.xlane.xlu1 %940 }
 0x25c   : > { %v1033_v14 = vadd.f32 %v1626_v13, %v941_v45  ;;  %v935_v15 = vpop.xlane.xlu0 %934 }
 0x25d   : > { %v1031_v16 = vadd.f32 %v1626_v13, %v935_v15 }
 0x25e   : > { %1066 = vst.msk [vmem:[%s1633_s8 + $0x10] sm:$0xff] %vm1063_vm2, %v1033_v14 }
 0x25f   : > { %1064 = vst.msk [vmem:[%s1633_s8] sm:$0xff] %vm1063_vm2, %v1031_v16  ;;  %v944_v17 = vpop.xlane.xlu1 %943 }
 0x260   : > { %v1034_v18 = vadd.f32 %v1626_v13, %v944_v17  ;;  %v938_v19 = vpop.xlane.xlu0 %937 }
 0x261   : > { %v1032_v20 = vadd.f32 %v1626_v13, %v938_v19 }
 0x262   : > { %1067 = vst.msk [vmem:[%s1633_s8 + $0x18] sm:$0xff] %vm1063_vm2, %v1034_v18 }
 0x263   : > { %1065 = vst.msk [vmem:[%s1633_s8 + $0x8] sm:$0xff] %vm1063_vm2, %v1032_v20 }
 0x264   : > { %v953_v21 = vpop.xlane.xlu0 %952 }
 0x265   : > { %v1037_v22 = vadd.f32 %v1626_v13, %v953_v21  ;;  %v956_v23 = vpop.xlane.xlu1 %955 }
 0x266   : > { %v1038_v24 = vadd.f32 %v1626_v13, %v956_v23 }
 0x267   : > { %1070 = vst.msk [vmem:[%s1633_s8 + $0x30] sm:$0xff] %vm1063_vm2, %v1037_v22 }
 0x268   : > { %1071 = vst.msk [vmem:[%s1633_s8 + $0x38] sm:$0xff] %vm1063_vm2, %v1038_v24  ;;  %v947_v25 = vpop.xlane.xlu0 %946 }
 0x269   : > { %v1035_v26 = vadd.f32 %v1626_v13, %v947_v25  ;;  %v950_v27 = vpop.xlane.xlu1 %949 }
 0x26a   : > { %v1036_v28 = vadd.f32 %v1626_v13, %v950_v27 }
 0x26b   : > { %1068 = vst.msk [vmem:[%s1633_s8 + $0x20] sm:$0xff] %vm1063_vm2, %v1035_v26 }
 0x26c   : > { %1069 = vst.msk [vmem:[%s1633_s8 + $0x28] sm:$0xff] %vm1063_vm2, %v1036_v28  ;;  %v965_v29 = vpop.xlane.xlu0 %964 }
 0x26d   : > { %v1041_v30 = vadd.f32 %v1626_v13, %v965_v29  ;;  %v968_v31 = vpop.xlane.xlu1 %967 }
 0x26e   : > { %v1042_v32 = vadd.f32 %v1626_v13, %v968_v31 }
 0x26f   : > { %1074 = vst.msk [vmem:[%s1633_s8 + $0x50] sm:$0xff] %vm1063_vm2, %v1041_v30 }
 0x270   : > { %1075 = vst.msk [vmem:[%s1633_s8 + $0x58] sm:$0xff] %vm1063_vm2, %v1042_v32  ;;  %v959_v33 = vpop.xlane.xlu0 %958 }
 0x271   : > { %v1039_v34 = vadd.f32 %v1626_v13, %v959_v33  ;;  %v962_v35 = vpop.xlane.xlu1 %961 }
 0x272   : > { %v1040_v36 = vadd.f32 %v1626_v13, %v962_v35 }
 0x273   : > { %1072 = vst.msk [vmem:[%s1633_s8 + $0x40] sm:$0xff] %vm1063_vm2, %v1039_v34 }
 0x274   : > { %1073 = vst.msk [vmem:[%s1633_s8 + $0x48] sm:$0xff] %vm1063_vm2, %v1040_v36  ;;  %v977_v37 = vpop.xlane.xlu0 %976 }
 0x275   : > { %v1045_v38 = vadd.f32 %v1626_v13, %v977_v37  ;;  %v980_v39 = vpop.xlane.xlu1 %979 }
 0x276   : > { %v1046_v41 = vadd.f32 %v1626_v13, %v980_v39 }
 0x277   : > { %1078 = vst.msk [vmem:[%s1633_s8 + $0x70] sm:$0xff] %vm1063_vm2, %v1045_v38 }
 0x278   : > { %1079 = vst.msk [vmem:[%s1633_s8 + $0x78] sm:$0xff] %vm1063_vm2, %v1046_v41  ;;  %v971_v42 = vpop.xlane.xlu0 %970 }
 0x279   : > { %v1043_v43 = vadd.f32 %v1626_v13, %v971_v42  ;;  %v974_v54 = vpop.xlane.xlu1 %973 }
 0x27a   : > { %v1044_v44 = vadd.f32 %v1626_v13, %v974_v54 }
 0x27b   : > { %1076 = vst.msk [vmem:[%s1633_s8 + $0x60] sm:$0xff] %vm1063_vm2, %v1043_v43 }
 0x27c   : > { %1077 = vst.msk [vmem:[%s1633_s8 + $0x68] sm:$0xff] %vm1063_vm2, %v1044_v44  ;;  %v989_v46 = vpop.xlane.xlu0 %988 }
 0x27d   : > { %v1049_v47 = vadd.f32 %v1626_v13, %v989_v46  ;;  %v992_v48 = vpop.xlane.xlu1 %991 }
 0x27e   : > { %v1050_v49 = vadd.f32 %v1626_v13, %v992_v48 }
 0x27f   : > { %1082 = vst.msk [vmem:[%s1633_s8 + $0x90] sm:$0xff] %vm1063_vm2, %v1049_v47 }
 0x280   : > { %1083 = vst.msk [vmem:[%s1633_s8 + $0x98] sm:$0xff] %vm1063_vm2, %v1050_v49  ;;  %v983_v50 = vpop.xlane.xlu0 %982 }
 0x281   : > { %v1047_v51 = vadd.f32 %v1626_v13, %v983_v50  ;;  %v986_v52 = vpop.xlane.xlu1 %985 }
 0x282   : > { %v1048_v53 = vadd.f32 %v1626_v13, %v986_v52 }
 0x283   : > { %1080 = vst.msk [vmem:[%s1633_s8 + $0x80] sm:$0xff] %vm1063_vm2, %v1047_v51 }
 0x284   : > { %1081 = vst.msk [vmem:[%s1633_s8 + $0x88] sm:$0xff] %vm1063_vm2, %v1048_v53  ;;  %v1001_v55 = vpop.xlane.xlu0 %1000 }
 0x285   : > { %v1053_v56 = vadd.f32 %v1626_v13, %v1001_v55  ;;  %v1004_v57 = vpop.xlane.xlu1 %1003 }
 0x286   : > { %v1054_v58 = vadd.f32 %v1626_v13, %v1004_v57 }
 0x287   : > { %1086 = vst.msk [vmem:[%s1633_s8 + $0xb0] sm:$0xff] %vm1063_vm2, %v1053_v56 }
 0x288   : > { %1087 = vst.msk [vmem:[%s1633_s8 + $0xb8] sm:$0xff] %vm1063_vm2, %v1054_v58  ;;  %v995_v59 = vpop.xlane.xlu0 %994 }
 0x289   : > { %v1051_v60 = vadd.f32 %v1626_v13, %v995_v59  ;;  %v998_v61 = vpop.xlane.xlu1 %997 }
 0x28a   : > { %v1052_v62 = vadd.f32 %v1626_v13, %v998_v61 }
 0x28b   : > { %1084 = vst.msk [vmem:[%s1633_s8 + $0xa0] sm:$0xff] %vm1063_vm2, %v1051_v60 }
 0x28c   : > { %1085 = vst.msk [vmem:[%s1633_s8 + $0xa8] sm:$0xff] %vm1063_vm2, %v1052_v62  ;;  %v1013_v63 = vpop.xlane.xlu0 %1012 }
 0x28d   : > { %v1057_v0 = vadd.f32 %v1626_v13, %v1013_v63  ;;  %v1016_v1 = vpop.xlane.xlu1 %1015 }
 0x28e   : > { %v1058_v2 = vadd.f32 %v1626_v13, %v1016_v1 }
 0x28f   : > { %1090 = vst.msk [vmem:[%s1633_s8 + $0xd0] sm:$0xff] %vm1063_vm2, %v1057_v0 }
 0x290   : > { %1091 = vst.msk [vmem:[%s1633_s8 + $0xd8] sm:$0xff] %vm1063_vm2, %v1058_v2  ;;  %v1007_v3 = vpop.xlane.xlu0 %1006 }
 0x291   : > { %v1055_v4 = vadd.f32 %v1626_v13, %v1007_v3  ;;  %v1010_v5 = vpop.xlane.xlu1 %1009 }
 0x292   : > { %v1056_v6 = vadd.f32 %v1626_v13, %v1010_v5 }
 0x293   : > { %1088 = vst.msk [vmem:[%s1633_s8 + $0xc0] sm:$0xff] %vm1063_vm2, %v1055_v4 }
 0x294   : > { %1089 = vst.msk [vmem:[%s1633_s8 + $0xc8] sm:$0xff] %vm1063_vm2, %v1056_v6  ;;  %v1019_v7 = vpop.xlane.xlu0 %1018 }
 0x295   : > { %v1059_v8 = vadd.f32 %v1626_v13, %v1019_v7 }
 0x296   : > { %v1022_v9 = vpop.xlane.xlu1 %1021 }
 0x297   : > { %1092 = vst.msk [vmem:[%s1633_s8 + $0xe0] sm:$0xff] %vm1063_vm2, %v1059_v8  ;;  %v1060_v40 = vadd.f32 %v1626_v13, %v1022_v9 }
 0x298   : > { %v1025_v10 = vpop.xlane.xlu0 %1024 }
 0x299   : > { %1093 = vst.msk [vmem:[%s1633_s8 + $0xe8] sm:$0xff] %vm1063_vm2, %v1060_v40  ;;  %v1061_v11 = vadd.f32 %v1626_v13, %v1025_v10 }
 0x29a   : > { %v1028_v12 = vpop.xlane.xlu1 %1027 }
 0x29b   : > { %1094 = vst.msk [vmem:[%s1633_s8 + $0xf0] sm:$0xff] %vm1063_vm2, %v1061_v11  ;;  %v1062_v45 = vadd.f32 %v1626_v13, %v1028_v12 }
 0x29d   : > { %1095 = vst.msk [vmem:[%s1633_s8 + $0xf8] sm:$0xff] %vm1063_vm2, %v1062_v45 }
 0x29e PF: > { %s18_s26 = sadd.s32 1, %s1338_s26  }
 0x29f   : > { %p15_p4 = scmp.ge.s32.totalorder %s18_s26, 5  }
 0x2a1   :  { %17 = sbr.rel (!%p15_p4) target bundleno = 2 (0x2), region = 78 }

</bundles_post_ra>
